<compile_context>
chip_gen: v7x
topology: tpu7x:2x2x1
jax: 0.10.0
libtpu: 0.0.40
codegen_flags: <defaults>
</compile_context>

<pallas_src>
import math

import numpy as np
import jax
import jax.numpy as jnp
from jax.experimental import pallas as pl
from jax.experimental.pallas import tpu as pltpu


class Results_Obj:
    """Mirror of the PyTorch Results_Obj wrapper."""

    def __init__(self):
        self.last_hidden_state = None

    def set_results(self, results):
        self.last_hidden_state = results


def _copy_kernel(x_ref, o_ref):
    # Pure pass-through of the current tile.
    o_ref[...] = x_ref[...]


_LANES = 128
# ~2 MiB per tile -> 2 arrays x 2 pipeline buffers x 2 MiB = 8 MiB VMEM,
# comfortably under the 16 MiB scoped default on v5e (and v6e/v7x).
_TARGET_TILE_BYTES = 2 * 1024 * 1024


def _pallas_identity(x: jax.Array) -> jax.Array:
    """Identity copy of `x` through a lane-dense, tiled pallas_call."""
    orig_shape = x.shape
    n = math.prod(orig_shape) if orig_shape else 1

    if n == 0 or n % _LANES != 0:
        # Rare fallback for shapes whose total size is not a multiple of 128:
        # single full-array block (full-extent dims are always legal).
        # TODO(synk): such shapes take an un-tiled path; fine for small arrays.
        return pl.pallas_call(
            _copy_kernel,
            out_shape=jax.ShapeDtypeStruct(orig_shape, x.dtype),
            compiler_params=pltpu.CompilerParams(vmem_limit_bytes=64 << 20),
        )(x)

    rows = n // _LANES
    x2d = x.reshape(rows, _LANES)   # contiguous reshape: layout no-op in HBM

    # Row-tile sizing: keep each tile around _TARGET_TILE_BYTES and the
    # sublane count a multiple of 64 (safe packing granularity for f32,
    # bf16, int8, fp8 and int4).  If the whole array already fits the
    # budget, use one full-extent block.
    bytes_per_row = _LANES * x.dtype.itemsize
    max_rows = max(64, (_TARGET_TILE_BYTES // bytes_per_row) // 64 * 64)
    if rows <= max_rows:
        row_tile = rows          # full extent -> always a legal block shape
        grid = (1,)
    else:
        row_tile = max_rows      # multiple of 64 -> satisfies (8,128) rule
        grid = (pl.cdiv(rows, row_tile),)

    out2d = pl.pallas_call(
        _copy_kernel,
        out_shape=jax.ShapeDtypeStruct((rows, _LANES), x.dtype),
        grid_spec=pltpu.PrefetchScalarGridSpec(
            num_scalar_prefetch=0,
            grid=grid,
            in_specs=[pl.BlockSpec((row_tile, _LANES), lambda i: (i, 0))],
            out_specs=pl.BlockSpec((row_tile, _LANES), lambda i: (i, 0)),
        ),
        compiler_params=pltpu.CompilerParams(
            dimension_semantics=("parallel",),
        ),
    )(x2d)
    return out2d.reshape(orig_shape)


# jit so the reshapes and the pallas_call fuse into one executable.
_pallas_identity_jit = jax.jit(_pallas_identity)


def nollm_backbone_forward(inputs_embeds: jax.Array) -> Results_Obj:
    """Pallas equivalent of NoLLM_Backbone.forward (identity pass-through)."""
    out = _pallas_identity_jit(inputs_embeds)
    results = Results_Obj()
    results.set_results(out)
    return results


if __name__ == "__main__":
    # NoLLM_Backbone.__init__ defines no parameters; only the input matters.
    key = jax.random.PRNGKey(0)
    B, S, H = 2, 8, 32  # (batch, seq_len, d_model)
    inputs_embeds = jax.random.normal(key, (B, S, H), dtype=jnp.float32)

    # Host-side snapshot for the semantics check.
    ref = np.asarray(inputs_embeds)

    results = nollm_backbone_forward(inputs_embeds)
    out = jax.block_until_ready(results.last_hidden_state)

    assert out.shape == (B, S, H)
    assert out.dtype == inputs_embeds.dtype
    assert np.array_equal(np.asarray(out), ref)

    print("KERNEL_OK")
</pallas_src>

<mosaic_0001>
module attributes {stable_mosaic.version = 11 : i64} {
  func.func @_copy_kernel(%arg0: i32, %arg1: memref<4x128xf32, #tpu.memory_space<vmem>>, %arg2: memref<4x128xf32, #tpu.memory_space<vmem>>) attributes {dimension_semantics = [#tpu.dimension_semantics<parallel>], iteration_bounds = array<i64: 1>, scalar_prefetch = 0 : i64, scratch_operands = 0 : i64, tpu.core_type = #tpu.core_type<tc>, window_params = [{transform_indices = @transform_0, window_bounds = array<i64: 4, 128>}, {transform_indices = @transform_1, window_bounds = array<i64: 4, 128>}]} {
    %c0 = arith.constant 0 : index
    %c0_0 = arith.constant 0 : index
    %0 = vector.load %arg1[%c0, %c0_0] : memref<4x128xf32, #tpu.memory_space<vmem>>, vector<4x128xf32>
    %c0_1 = arith.constant 0 : index
    %c0_2 = arith.constant 0 : index
    %1 = vector.load %arg2[%c0_1, %c0_2] : memref<4x128xf32, #tpu.memory_space<vmem>>, vector<4x128xf32>
    tpu.vector_store %arg2[%c0_1, %c0_2], %0 {strides = array<i32>} : memref<4x128xf32, #tpu.memory_space<vmem>>, vector<4x128xf32>,
    return
  }
  func.func @transform_0(%arg0: i32) -> (i32, i32) {
    %c0_i32 = arith.constant 0 : i32
    %c0_i32_0 = arith.constant 0 : i32
    return %arg0, %c0_i32 : i32, i32
  }
  func.func @transform_1(%arg0: i32) -> (i32, i32) {
    %c0_i32 = arith.constant 0 : i32
    %c0_i32_0 = arith.constant 0 : i32
    return %arg0, %c0_i32 : i32, i32
  }
}

</mosaic_0001>

<bundles_post_ra>
// kernel: _pallas_identity.1
= control target key start
LH: loop header
LB: loop body
LE: loop exit
PB: predicated region body
PF: predicated region fallthrough
CT: control target
= control target key end

     0   :  { %s30_s0 = inlined_call_operand.vmem [shape: f32[4,128], index: 0, kind: input, shape index: {}]   ;;  %s31_s1 = inlined_call_operand.vmem [shape: f32[4,128], index: 1, kind: output, shape index: {}]  }
   0x1   :  { %v8_v0 = vld [vmem:[%s30_s0] sm:$0xf] }
   0x2   :  { %9 = vst [vmem:[%s31_s1] sm:$0xf] %v8_v0 }

</bundles_post_ra>
